<compile_context>
chip_gen: v7x
topology: tpu7x:2x2x1
jax: 0.10.0
libtpu: 0.0.40
codegen_flags: <defaults>
</compile_context>

<pallas_src>
import functools

import jax
import jax.numpy as jnp
import numpy as np
from jax.experimental import pallas as pl
from jax.experimental.pallas import tpu as pltpu


def _round_up(x, m):
    return ((x + m - 1) // m) * m


def _bce_logits(x, z):
    # Numerically stable BCE-with-logits: max(x,0) - x*z + log(1 + exp(-|x|))
    return jnp.maximum(x, 0.0) - x * z + jnp.log(1.0 + jnp.exp(-jnp.abs(x)))


# ---------------------------------------------------------------------------
# Kernel
# ---------------------------------------------------------------------------
def yolo_loss_kernel(d, n_real, n_padded, lane_tile, tiles_per_split, rows_out,
                     p_ref, t_ref, out_ref,
                     acc_ch, acc_nobce, acc_nobj, acc_nnoobj):
    """Grid = (num_splits, tiles_per_split).  One step reduces a (d, lane_tile)
    channel-major tile.  Accumulators stay lane-dense across the inner
    ("arbitrary") axis; the only cross-lane reduction is the once-per-split
    finalize, which emits raw sums for the wrapper to combine."""
    s = pl.program_id(0)
    tt = pl.program_id(1)
    last = pl.num_programs(1) - 1

    @pl.when(tt == 0)
    def _():
        acc_ch[...] = jnp.zeros_like(acc_ch)
        acc_nobce[...] = jnp.zeros_like(acc_nobce)
        acc_nobj[...] = jnp.zeros_like(acc_nobj)
        acc_nnoobj[...] = jnp.zeros_like(acc_nnoobj)

    p = p_ref[...].astype(jnp.float32)            # (d, lane_tile)
    t = t_ref[...].astype(jnp.float32)

    t0 = t[0:1, :]                                # (1, lane_tile) objectness
    obj_m = t0 == 1.0
    noobj_m = t0 == 0.0
    if n_padded > n_real:                         # static: mask padded lanes
        lane = jax.lax.broadcasted_iota(jnp.int32, (1, lane_tile), 1)
        start = (s * tiles_per_split + tt) * lane_tile
        valid = (lane + start) < n_real
        obj_m = jnp.logical_and(obj_m, valid)
        noobj_m = jnp.logical_and(noobj_m, valid)
    obj_f = obj_m.astype(jnp.float32)             # (1, lane_tile)
    noobj_f = noobj_m.astype(jnp.float32)

    bce = _bce_logits(p, t)                       # (d, lane_tile)
    sq = (p - t) * (p - t)

    # Per-channel select: box channels (1..4) take squared error, others BCE.
    ch = jax.lax.broadcasted_iota(jnp.int32, (d, 1), 0)
    is_box = jnp.logical_and(ch >= 1, ch <= 4)    # (d, 1) compile-time pattern
    combined = jnp.where(is_box, sq, bce) * obj_f  # (d, lane_tile)

    acc_ch[...] += combined                        # per-channel obj sums
    acc_nobce[...] += bce[0:1, :] * noobj_f        # noobj BCE (channel 0)
    acc_nobj[...] += obj_f                         # n_obj
    acc_nnoobj[...] += noobj_f                     # n_noobj

    @pl.when(tt == last)
    def _():
        pieces = [
            jnp.sum(acc_ch[...], axis=1, keepdims=True),      # (d, 1)
            jnp.sum(acc_nobce[...], axis=1, keepdims=True),   # (1, 1)
            jnp.sum(acc_nobj[...], axis=1, keepdims=True),    # (1, 1)
            jnp.sum(acc_nnoobj[...], axis=1, keepdims=True),  # (1, 1)
        ]
        pad = rows_out - (d + 3)
        if pad:
            pieces.append(jnp.zeros((pad, 1), jnp.float32))
        all_sums = jnp.concatenate(pieces, axis=0)            # (rows_out, 1)
        # Lane-dense (unmasked) store of this split's partial sums.
        out_ref[...] = jnp.broadcast_to(all_sums, (1, rows_out, 128))


# ---------------------------------------------------------------------------
# Wrapper (glue)
# ---------------------------------------------------------------------------
def yolo_loss(predictions, targets,
              lambda_obj=15.0, lambda_noobj=0.1, lambda_coord=10.0,
              lambda_class=1.0, lane_tile=16384, num_splits=None):
    """predictions/targets: (..., 5 + n_fault_types) -> scalar loss.

    If n_obj == 0 or n_noobj == 0 the corresponding term is NaN and poisons the
    total — identical to PyTorch's mean over an empty selection."""
    assert predictions.shape == targets.shape, "pred/target shape mismatch"
    *lead, d = predictions.shape
    assert d >= 6, "need objectness + 4 box coords + >=1 class channel"
    n = int(np.prod(lead)) if lead else 1

    def prep(x):
        # Keep bf16 as-is (halved HBM traffic); everything else goes to f32.
        if x.dtype != jnp.bfloat16:
            x = x.astype(jnp.float32)
        return x.reshape(n, d).T                  # (d, n) channel-major

    lane_tile = max(128, _round_up(int(lane_tile), 128))
    if num_splits is None:
        # One split per v7x TensorCore when there is enough work; a single
        # split otherwise (extra splits are harmless but add a little padding).
        num_splits = 2 if n >= 2048 else 1
    num_splits = max(1, int(num_splits))

    per_split = -(-n // num_splits)
    tn = min(lane_tile, _round_up(per_split, 128))
    tiles_per_split = -(-per_split // tn)
    n_padded = num_splits * tiles_per_split * tn

    p_cm = prep(predictions)
    t_cm = prep(targets)
    if n_padded > n:
        p_cm = jnp.pad(p_cm, ((0, 0), (0, n_padded - n)))
        t_cm = jnp.pad(t_cm, ((0, 0), (0, n_padded - n)))

    rows_out = _round_up(d + 3, 8)
    kernel = functools.partial(yolo_loss_kernel, d, n, n_padded, tn,
                               tiles_per_split, rows_out)

    def in_map(s, t):
        return (0, s * tiles_per_split + t)

    part = pl.pallas_call(
        kernel,
        out_shape=jax.ShapeDtypeStruct((num_splits, rows_out, 128), jnp.float32),
        grid=(num_splits, tiles_per_split),
        in_specs=[pl.BlockSpec((d, tn), in_map),
                  pl.BlockSpec((d, tn), in_map)],
        out_specs=pl.BlockSpec((1, rows_out, 128), lambda s, t: (s, 0, 0)),
        scratch_shapes=[pltpu.VMEM((d, tn), jnp.float32),
                        pltpu.VMEM((1, tn), jnp.float32),
                        pltpu.VMEM((1, tn), jnp.float32),
                        pltpu.VMEM((1, tn), jnp.float32)],
        compiler_params=pltpu.CompilerParams(
            dimension_semantics=("parallel", "arbitrary")),
    )(p_cm, t_cm)

    # Trivial cross-split combine + weighting (O(num_splits * (d+3)) scalars).
    sums = jnp.sum(part[:, :, 0], axis=0)         # (rows_out,)
    obj_sum = sums[0]
    box_sum = jnp.sum(sums[1:5])
    cls_sum = jnp.sum(sums[5:d])
    noobj_sum = sums[d]
    n_obj = sums[d + 1]
    n_noobj = sums[d + 2]

    obj_loss = obj_sum / n_obj
    noobj_loss = noobj_sum / n_noobj
    box_loss = box_sum / (4.0 * n_obj)
    cls_loss = cls_sum / (float(d - 5) * n_obj)
    return (lambda_obj * obj_loss + lambda_noobj * noobj_loss
            + lambda_coord * box_loss + lambda_class * cls_loss)


# ---------------------------------------------------------------------------
# Pure-JAX reference (mirrors the PyTorch YOLOLoss.forward semantics)
# ---------------------------------------------------------------------------
def ref_yolo_loss(predictions, targets,
                  lambda_obj=15.0, lambda_noobj=0.1, lambda_coord=10.0,
                  lambda_class=1.0):
    p = predictions.astype(jnp.float32)
    t = targets.astype(jnp.float32)
    t0 = t[..., 0]
    obj = t0 == 1.0
    noobj = t0 == 0.0

    def bce(x, z):
        return jnp.maximum(x, 0.0) - x * z + jnp.log(1.0 + jnp.exp(-jnp.abs(x)))

    n_obj = jnp.sum(obj).astype(jnp.float32)
    n_noobj = jnp.sum(noobj).astype(jnp.float32)
    n_cls = p.shape[-1] - 5

    obj_loss = jnp.sum(jnp.where(obj, bce(p[..., 0], t0), 0.0)) / n_obj
    noobj_loss = jnp.sum(jnp.where(noobj, bce(p[..., 0], t0), 0.0)) / n_noobj
    box_loss = jnp.sum(jnp.where(obj[..., None],
                                 (p[..., 1:5] - t[..., 1:5]) ** 2, 0.0)) / (4.0 * n_obj)
    cls_loss = jnp.sum(jnp.where(obj[..., None],
                                 bce(p[..., 5:], t[..., 5:]), 0.0)) / (n_cls * n_obj)
    return (lambda_obj * obj_loss + lambda_noobj * noobj_loss
            + lambda_coord * box_loss + lambda_class * cls_loss)


# ---------------------------------------------------------------------------
# Deterministic synthetic test
# ---------------------------------------------------------------------------
def _make_inputs(key, B, G, n_fault):
    D = 5 + n_fault
    kp, ko, kb, kc = jax.random.split(key, 4)
    predictions = jax.random.normal(kp, (B, G, D), jnp.float32)
    obj = (jax.random.uniform(ko, (B, G)) < 0.3).astype(jnp.float32)  # {0,1}
    obj = obj.at[0, 0].set(1.0).at[0, 1].set(0.0)  # guarantee obj & noobj cells
    boxes = jax.random.uniform(kb, (B, G, 4), jnp.float32)
    cls_idx = jax.random.randint(kc, (B, G), 0, n_fault)
    cls = jax.nn.one_hot(cls_idx, n_fault, dtype=jnp.float32)
    targets = jnp.concatenate([obj[..., None], boxes, cls], axis=-1)
    return predictions, targets


if __name__ == "__main__":
    key = jax.random.PRNGKey(0)
    k1, k2, k3 = jax.random.split(key, 3)

    # Config 1: B=4, grid=32, 3 fault types -> single split, single tile.
    preds, tgts = _make_inputs(k1, B=4, G=32, n_fault=3)
    out1 = jax.block_until_ready(yolo_loss(preds, tgts))
    ref1 = jax.block_until_ready(ref_yolo_loss(preds, tgts))
    np.testing.assert_allclose(np.asarray(out1), np.asarray(ref1), rtol=1e-5, atol=1e-5)

    # Config 2: multi-tile accumulation + 2 parallel splits + padded remainder.
    preds2, tgts2 = _make_inputs(k2, B=4, G=200, n_fault=3)
    out2 = jax.block_until_ready(yolo_loss(preds2, tgts2, lane_tile=128, num_splits=2))
    ref2 = jax.block_until_ready(ref_yolo_loss(preds2, tgts2))
    np.testing.assert_allclose(np.asarray(out2), np.asarray(ref2), rtol=1e-5, atol=1e-5)

    # Config 3: bf16 inputs (halved HBM traffic path); maths still f32 in-kernel.
    preds3, tgts3 = _make_inputs(k3, B=2, G=512, n_fault=3)
    preds3 = preds3.astype(jnp.bfloat16)
    tgts3 = tgts3.astype(jnp.bfloat16)
    out3 = jax.block_until_ready(yolo_loss(preds3, tgts3))
    ref3 = jax.block_until_ready(ref_yolo_loss(preds3, tgts3))
    np.testing.assert_allclose(np.asarray(out3), np.asarray(ref3), rtol=1e-4, atol=1e-4)

    print("KERNEL_OK")
</pallas_src>

<mosaic_0001>
module attributes {stable_mosaic.version = 11 : i64} {
  func.func @yolo_loss_kernel(%arg0: i32, %arg1: i32, %arg2: memref<8x128xf32, #tpu.memory_space<vmem>>, %arg3: memref<8x128xf32, #tpu.memory_space<vmem>>, %arg4: memref<1x16x128xf32, #tpu.memory_space<vmem>>, %arg5: memref<8x128xf32, #tpu.memory_space<vmem>>, %arg6: memref<1x128xf32, #tpu.memory_space<vmem>>, %arg7: memref<1x128xf32, #tpu.memory_space<vmem>>, %arg8: memref<1x128xf32, #tpu.memory_space<vmem>>) attributes {dimension_semantics = [#tpu.dimension_semantics<parallel>, #tpu.dimension_semantics<arbitrary>], iteration_bounds = array<i64: 1, 1>, scalar_prefetch = 0 : i64, scratch_operands = 4 : i64, tpu.core_type = #tpu.core_type<tc>, window_params = [{transform_indices = @transform_0, window_bounds = array<i64: 8, 128>}, {transform_indices = @transform_1, window_bounds = array<i64: 8, 128>}, {transform_indices = @transform_2, window_bounds = array<i64: 1, 16, 128>}]} {
    %c0_i32 = arith.constant 0 : i32
    %0 = arith.cmpi eq, %arg1, %c0_i32 : i32
    %1 = arith.extui %0 : i1 to i32
    %c0_i32_0 = arith.constant 0 : i32
    %2 = arith.cmpi ne, %1, %c0_i32_0 : i32
    scf.if %2 {
      %cst_26 = arith.constant 0.000000e+00 : f32
      %57 = vector.broadcast %cst_26 : f32 to vector<8x128xf32>
      %c0_27 = arith.constant 0 : index
      %c0_28 = arith.constant 0 : index
      %58 = vector.load %arg5[%c0_27, %c0_28] : memref<8x128xf32, #tpu.memory_space<vmem>>, vector<8x128xf32>
      tpu.vector_store %arg5[%c0_27, %c0_28], %57 {strides = array<i32>} : memref<8x128xf32, #tpu.memory_space<vmem>>, vector<8x128xf32>,
      %cst_29 = arith.constant 0.000000e+00 : f32
      %59 = vector.broadcast %cst_29 : f32 to vector<1x128xf32>
      %c0_30 = arith.constant 0 : index
      %c0_31 = arith.constant 0 : index
      %60 = vector.load %arg6[%c0_30, %c0_31] : memref<1x128xf32, #tpu.memory_space<vmem>>, vector<1x128xf32>
      tpu.vector_store %arg6[%c0_30, %c0_31], %59 {strides = array<i32>} : memref<1x128xf32, #tpu.memory_space<vmem>>, vector<1x128xf32>,
      %cst_32 = arith.constant 0.000000e+00 : f32
      %61 = vector.broadcast %cst_32 : f32 to vector<1x128xf32>
      %c0_33 = arith.constant 0 : index
      %c0_34 = arith.constant 0 : index
      %62 = vector.load %arg7[%c0_33, %c0_34] : memref<1x128xf32, #tpu.memory_space<vmem>>, vector<1x128xf32>
      tpu.vector_store %arg7[%c0_33, %c0_34], %61 {strides = array<i32>} : memref<1x128xf32, #tpu.memory_space<vmem>>, vector<1x128xf32>,
      %cst_35 = arith.constant 0.000000e+00 : f32
      %63 = vector.broadcast %cst_35 : f32 to vector<1x128xf32>
      %c0_36 = arith.constant 0 : index
      %c0_37 = arith.constant 0 : index
      %64 = vector.load %arg8[%c0_36, %c0_37] : memref<1x128xf32, #tpu.memory_space<vmem>>, vector<1x128xf32>
      tpu.vector_store %arg8[%c0_36, %c0_37], %63 {strides = array<i32>} : memref<1x128xf32, #tpu.memory_space<vmem>>, vector<1x128xf32>,
    } else {
    }
    %c0 = arith.constant 0 : index
    %c0_1 = arith.constant 0 : index
    %3 = vector.load %arg2[%c0, %c0_1] : memref<8x128xf32, #tpu.memory_space<vmem>>, vector<8x128xf32>
    %c0_2 = arith.constant 0 : index
    %c0_3 = arith.constant 0 : index
    %4 = vector.load %arg3[%c0_2, %c0_3] : memref<8x128xf32, #tpu.memory_space<vmem>>, vector<8x128xf32>
    %5 = vector.extract_strided_slice %4 {offsets = [0, 0], sizes = [1, 128], strides = [1, 1]} : vector<8x128xf32> to vector<1x128xf32>
    %cst = arith.constant 1.000000e+00 : f32
    %6 = vector.broadcast %cst : f32 to vector<1x128xf32>
    %7 = arith.cmpf oeq, %5, %6 : vector<1x128xf32>
    %cst_4 = arith.constant 0.000000e+00 : f32
    %8 = vector.broadcast %cst_4 : f32 to vector<1x128xf32>
    %9 = arith.cmpf oeq, %5, %8 : vector<1x128xf32>
    %10 = arith.extui %7 : vector<1x128xi1> to vector<1x128xi32>
    %11 = arith.sitofp %10 : vector<1x128xi32> to vector<1x128xf32>
    %12 = arith.extui %9 : vector<1x128xi1> to vector<1x128xi32>
    %13 = arith.sitofp %12 : vector<1x128xi32> to vector<1x128xf32>
    %cst_5 = arith.constant 0.000000e+00 : f32
    %14 = vector.broadcast %cst_5 : f32 to vector<8x128xf32>
    %15 = arith.maximumf %3, %14 : vector<8x128xf32>
    %16 = arith.mulf %3, %4 : vector<8x128xf32>
    %17 = arith.subf %15, %16 : vector<8x128xf32>
    %18 = math.absf %3 : vector<8x128xf32>
    %cst_6 = arith.constant 0.000000e+00 : f32
    %19 = vector.broadcast %cst_6 : f32 to vector<8x128xf32>
    %20 = arith.subf %19, %18 : vector<8x128xf32>
    %21 = math.exp %20 : vector<8x128xf32>
    %cst_7 = arith.constant 1.000000e+00 : f32
    %22 = vector.broadcast %cst_7 : f32 to vector<8x128xf32>
    %23 = arith.addf %22, %21 : vector<8x128xf32>
    %24 = math.log %23 : vector<8x128xf32>
    %25 = arith.addf %17, %24 : vector<8x128xf32>
    %26 = arith.subf %3, %4 : vector<8x128xf32>
    %27 = arith.subf %3, %4 : vector<8x128xf32>
    %28 = arith.mulf %26, %27 : vector<8x128xf32>
    %29 = tpu.iota {dimensions = array<i32: 0>} : vector<8x1xi32>
    %c1_i32 = arith.constant 1 : i32
    %30 = vector.broadcast %c1_i32 : i32 to vector<8x1xi32>
    %31 = arith.cmpi sge, %29, %30 : vector<8x1xi32>
    %c4_i32 = arith.constant 4 : i32
    %32 = vector.broadcast %c4_i32 : i32 to vector<8x1xi32>
    %33 = arith.cmpi sle, %29, %32 : vector<8x1xi32>
    %34 = arith.andi %31, %33 : vector<8x1xi1>
    %35 = vector.shape_cast %34 : vector<8x1xi1> to vector<8x1xi1>
    %36 = vector.broadcast %35 : vector<8x1xi1> to vector<8x128xi1>
    %37 = arith.select %36, %28, %25 : vector<8x128xi1>, vector<8x128xf32>
    %38 = vector.broadcast %11 : vector<1x128xf32> to vector<8x128xf32>
    %39 = arith.mulf %37, %38 : vector<8x128xf32>
    %c0_8 = arith.constant 0 : index
    %c0_9 = arith.constant 0 : index
    %40 = vector.load %arg5[%c0_8, %c0_9] : memref<8x128xf32, #tpu.memory_space<vmem>>, vector<8x128xf32>
    %41 = arith.addf %40, %39 : vector<8x128xf32>
    %c0_10 = arith.constant 0 : index
    %c0_11 = arith.constant 0 : index
    %42 = vector.load %arg5[%c0_10, %c0_11] : memref<8x128xf32, #tpu.memory_space<vmem>>, vector<8x128xf32>
    tpu.vector_store %arg5[%c0_10, %c0_11], %41 {strides = array<i32>} : memref<8x128xf32, #tpu.memory_space<vmem>>, vector<8x128xf32>,
    %c0_12 = arith.constant 0 : index
    %c0_13 = arith.constant 0 : index
    %43 = vector.load %arg6[%c0_12, %c0_13] : memref<1x128xf32, #tpu.memory_space<vmem>>, vector<1x128xf32>
    %44 = vector.extract_strided_slice %25 {offsets = [0, 0], sizes = [1, 128], strides = [1, 1]} : vector<8x128xf32> to vector<1x128xf32>
    %45 = arith.mulf %44, %13 : vector<1x128xf32>
    %46 = arith.addf %43, %45 : vector<1x128xf32>
    %c0_14 = arith.constant 0 : index
    %c0_15 = arith.constant 0 : index
    %47 = vector.load %arg6[%c0_14, %c0_15] : memref<1x128xf32, #tpu.memory_space<vmem>>, vector<1x128xf32>
    tpu.vector_store %arg6[%c0_14, %c0_15], %46 {strides = array<i32>} : memref<1x128xf32, #tpu.memory_space<vmem>>, vector<1x128xf32>,
    %c0_16 = arith.constant 0 : index
    %c0_17 = arith.constant 0 : index
    %48 = vector.load %arg7[%c0_16, %c0_17] : memref<1x128xf32, #tpu.memory_space<vmem>>, vector<1x128xf32>
    %49 = arith.addf %48, %11 : vector<1x128xf32>
    %c0_18 = arith.constant 0 : index
    %c0_19 = arith.constant 0 : index
    %50 = vector.load %arg7[%c0_18, %c0_19] : memref<1x128xf32, #tpu.memory_space<vmem>>, vector<1x128xf32>
    tpu.vector_store %arg7[%c0_18, %c0_19], %49 {strides = array<i32>} : memref<1x128xf32, #tpu.memory_space<vmem>>, vector<1x128xf32>,
    %c0_20 = arith.constant 0 : index
    %c0_21 = arith.constant 0 : index
    %51 = vector.load %arg8[%c0_20, %c0_21] : memref<1x128xf32, #tpu.memory_space<vmem>>, vector<1x128xf32>
    %52 = arith.addf %51, %13 : vector<1x128xf32>
    %c0_22 = arith.constant 0 : index
    %c0_23 = arith.constant 0 : index
    %53 = vector.load %arg8[%c0_22, %c0_23] : memref<1x128xf32, #tpu.memory_space<vmem>>, vector<1x128xf32>
    tpu.vector_store %arg8[%c0_22, %c0_23], %52 {strides = array<i32>} : memref<1x128xf32, #tpu.memory_space<vmem>>, vector<1x128xf32>,
    %c0_i32_24 = arith.constant 0 : i32
    %54 = arith.cmpi eq, %arg1, %c0_i32_24 : i32
    %55 = arith.extui %54 : i1 to i32
    %c0_i32_25 = arith.constant 0 : i32
    %56 = arith.cmpi ne, %55, %c0_i32_25 : i32
    scf.if %56 {
      %c0_26 = arith.constant 0 : index
      %c0_27 = arith.constant 0 : index
      %57 = vector.load %arg5[%c0_26, %c0_27] : memref<8x128xf32, #tpu.memory_space<vmem>>, vector<8x128xf32>
      %cst_28 = arith.constant dense<0.000000e+00> : vector<8xf32>
      %58 = vector.multi_reduction <add>, %57, %cst_28 [1] : vector<8x128xf32> to vector<8xf32>
      %59 = vector.shape_cast %58 : vector<8xf32> to vector<8x1xf32>
      %c0_29 = arith.constant 0 : index
      %c0_30 = arith.constant 0 : index
      %60 = vector.load %arg6[%c0_29, %c0_30] : memref<1x128xf32, #tpu.memory_space<vmem>>, vector<1x128xf32>
      %cst_31 = arith.constant dense<0.000000e+00> : vector<1xf32>
      %61 = vector.multi_reduction <add>, %60, %cst_31 [1] : vector<1x128xf32> to vector<1xf32>
      %62 = vector.shape_cast %61 : vector<1xf32> to vector<1x1xf32>
      %c0_32 = arith.constant 0 : index
      %c0_33 = arith.constant 0 : index
      %63 = vector.load %arg7[%c0_32, %c0_33] : memref<1x128xf32, #tpu.memory_space<vmem>>, vector<1x128xf32>
      %cst_34 = arith.constant dense<0.000000e+00> : vector<1xf32>
      %64 = vector.multi_reduction <add>, %63, %cst_34 [1] : vector<1x128xf32> to vector<1xf32>
      %65 = vector.shape_cast %64 : vector<1xf32> to vector<1x1xf32>
      %c0_35 = arith.constant 0 : index
      %c0_36 = arith.constant 0 : index
      %66 = vector.load %arg8[%c0_35, %c0_36] : memref<1x128xf32, #tpu.memory_space<vmem>>, vector<1x128xf32>
      %cst_37 = arith.constant dense<0.000000e+00> : vector<1xf32>
      %67 = vector.multi_reduction <add>, %66, %cst_37 [1] : vector<1x128xf32> to vector<1xf32>
      %68 = vector.shape_cast %67 : vector<1xf32> to vector<1x1xf32>
      %cst_38 = arith.constant 0.000000e+00 : f32
      %69 = vector.broadcast %cst_38 : f32 to vector<5x1xf32>
      %70 = tpu.concatenate %59, %62, %65, %68, %69 in 0 : vector<8x1xf32>, vector<1x1xf32>, vector<1x1xf32>, vector<1x1xf32>, vector<5x1xf32> -> vector<16x1xf32>
      %71 = vector.shape_cast %70 : vector<16x1xf32> to vector<1x16x1xf32>
      %72 = vector.broadcast %71 : vector<1x16x1xf32> to vector<1x16x128xf32>
      %c0_39 = arith.constant 0 : index
      %c0_40 = arith.constant 0 : index
      %c0_41 = arith.constant 0 : index
      %73 = vector.load %arg4[%c0_39, %c0_40, %c0_41] : memref<1x16x128xf32, #tpu.memory_space<vmem>>, vector<1x16x128xf32>
      tpu.vector_store %arg4[%c0_39, %c0_40, %c0_41], %72 {strides = array<i32>} : memref<1x16x128xf32, #tpu.memory_space<vmem>>, vector<1x16x128xf32>,
    } else {
    }
    return
  }
  func.func @transform_0(%arg0: i32, %arg1: i32) -> (i32, i32) {
    %c1_i32 = arith.constant 1 : i32
    %0 = arith.muli %arg0, %c1_i32 : i32
    %1 = arith.addi %0, %arg1 : i32
    %c0_i32 = arith.constant 0 : i32
    %c0_i32_0 = arith.constant 0 : i32
    return %c0_i32, %1 : i32, i32
  }
  func.func @transform_1(%arg0: i32, %arg1: i32) -> (i32, i32) {
    %c1_i32 = arith.constant 1 : i32
    %0 = arith.muli %arg0, %c1_i32 : i32
    %1 = arith.addi %0, %arg1 : i32
    %c0_i32 = arith.constant 0 : i32
    %c0_i32_0 = arith.constant 0 : i32
    return %c0_i32, %1 : i32, i32
  }
  func.func @transform_2(%arg0: i32, %arg1: i32) -> (i32, i32, i32) {
    %c0_i32 = arith.constant 0 : i32
    %c0_i32_0 = arith.constant 0 : i32
    %c0_i32_1 = arith.constant 0 : i32
    return %arg0, %c0_i32, %c0_i32_0 : i32, i32, i32
  }
}

</mosaic_0001>

<bundles_post_ra>
// kernel: tpu_custom_call.1
= control target key start
LH: loop header
LB: loop body
LE: loop exit
PB: predicated region body
PF: predicated region fallthrough
CT: control target
= control target key end

     0   :  { %7 = vsyncpa [#allocation7], 0  ;;  %s308_s0 = inlined_call_operand.hbm [shape: f32[8,128], index: 0, kind: input, shape index: {}]   ;;  %s309_s1 = inlined_call_operand.hbm [shape: f32[8,128], index: 1, kind: input, shape index: {}]   ;;  %s310_s2 = inlined_call_operand.hbm [shape: f32[1,16,128], index: 2, kind: output, shape index: {}]  }
   0x1   :  { %8 = vsyncpa [#allocation10], 0 }
   0x2   :  { %9 = vsyncpa [#allocation8], 0  ;;  %s246_s9 = smov [#allocation6]   ;;  %s247_s11 = smov [#allocation9]  }
   0x3   :  { %s19_s10 = sshll.u32 %s246_s9, 4  ;;  %s32_s12 = sshll.u32 %s247_s11, 4  ;;  %s20_s10 = int_to_ptr.vmem [resolvable:$true] %s19_s10  ;;  %s33_s12 = int_to_ptr.vmem [resolvable:$true] %s32_s12 }
   0x4   :  { %s174_s15 = scalar_lea.hbm %s308_s0, 128 }
   0x5   :  { %p175_p0 = scmp.ne.s32.totalorder %s308_s0, %s174_s15  ;;  %p178_p1 = scmp.lt.u32.totalorder %s174_s15, %s308_s0 }
   0x7   :  { %p180_p2 = pnand %p178_p1, %p175_p0 }
   0x9   :  { %183 = shalt.err (!%p180_p2)
}
   0xa   :  { %s184_s20 = scalar_lea.vmem %s20_s10, 128  ;;  %p189_p4 = scmp.lt.s32.totalorder %s20_s10, %s20_s10 }
   0xb   :  { %p185_p3 = scmp.ne.s32.totalorder %s20_s10, %s184_s20  ;;  %p190_p5 = scmp.lt.s32.totalorder %s184_s20, %s184_s20 }
   0xd   :  { %p191_p6 = por %p190_p5, %p189_p4 }
   0xf   :  { %p192_p7 = pnand %p191_p6, %p185_p3 }
  0x11   :  { %195 = shalt.err (!%p192_p7)
}
  0x12   :  { %22 = dma.hbm_to_vmem [thread:$0]  %s308_s0, 128, %s20_s10, [#allocation7]  }
  0x13   :  { %s196_s25 = scalar_lea.hbm %s309_s1, 128 }
  0x14   :  { %p197_p8 = scmp.ne.s32.totalorder %s309_s1, %s196_s25  ;;  %p200_p9 = scmp.lt.u32.totalorder %s196_s25, %s309_s1 }
  0x16   :  { %p202_p10 = pnand %p200_p9, %p197_p8 }
  0x18   :  { %205 = shalt.err (!%p202_p10)
}
  0x19   :  { %s206_s30 = scalar_lea.vmem %s33_s12, 128  ;;  %p211_p12 = scmp.lt.s32.totalorder %s33_s12, %s33_s12 }
  0x1a   :  { %p207_p11 = scmp.ne.s32.totalorder %s33_s12, %s206_s30  ;;  %p212_p13 = scmp.lt.s32.totalorder %s206_s30, %s206_s30 }
  0x1c   :  { %p213_p0 = por %p212_p13, %p211_p12 }
  0x1e   :  { %p214_p1 = pnand %p213_p0, %p207_p11 }
  0x20   :  { %217 = shalt.err (!%p214_p1)
}
  0x21   :  { %35 = dma.hbm_to_vmem [thread:$0]  %s309_s1, 128, %s33_s12, [#allocation10]  }
  0x22   :  { %240 = dma.done.wait [#allocation7], 128  }
  0x23   :  { %241 = vsyncadd [#allocation7], 4294967168 }
  0x24   :  { %242 = dma.done.wait [#allocation10], 128  }
  0x25   :  { %243 = vsyncadd [#allocation10], 4294967168  ;;  %v248_v0 = vmov 0.0   ;;  %v53_v1 = vld [vmem:[#allocation9] sm:$0xff]  ;;  %v52_v2 = vld [vmem:[#allocation6] sm:$0xff]  ;;  %vm106_vm2 = vcmask 1040384   ;;  %v73_v23 = vlaneseq }
  0x26   :  { %50 = vst [vmem:[#allocation4] sm:$0x1] %v248_v0  ;;  %49 = vst [vmem:[#allocation3] sm:$0x1] %v248_v0  ;;  %vm54_vm0 = vcmp.eq.f32.partialorder %v53_v1, 1.0  ;;  %vm55_vm1 = vcmp.eq.f32.partialorder %v53_v1, 0.0  ;;  %v61_v19 = vmul.f32 %v53_v1, %v52_v2  ;;  %v71_v29 = vsub.f32 %v52_v2, %v53_v1 }
  0x27   :  { %51 = vst [vmem:[#allocation5] sm:$0x1] %v248_v0  ;;  %v159_v5 = vsel %vm54_vm0, 1.0, %v248_v0  ;;  %v160_v6 = vsel %vm55_vm1, 1.0, %v248_v0  ;;  %v63_v7 = vand.u32 2147483647, %v52_v2 }
  0x28   :  { %v60_v18 = vmax.f32 %v52_v2, 0.0  ;;  %v74_v27 = vshrl.u32 %v73_v23, 7  ;;  %v72_v31 = vmul.f32 %v71_v29, %v71_v29  ;;  %v249_v37 = vmov 0   ;;  %s250_s1 = smov [#allocation11]  }
  0x29   :  { %v64_v10 = vsub.f32 0.0, %v63_v7  ;;  %169 = vset.pattern.permute.xlu1 %v249_v37  ;;  %168 = vset.pattern.permute.xlu0 %v249_v37  ;;  %vm125_vm6 = vcmask 1041408   ;;  %vm127_vm7 = vcmask 1042432   ;;  %s146_s4 = sshll.u32 %s250_s1, 4  ;;  %s147_s4 = int_to_ptr.vmem [resolvable:$true] %s146_s4 }
  0x2a   :  { %v62_v20 = vsub.f32 %v60_v18, %v61_v19  ;;  %vm75_vm3 = vcmp.ge.s32.totalorder %v74_v27, 1  ;;  %vm76_vm4 = vcmp.le.s32.totalorder %v74_v27, 4  ;;  %v83_v30 = vsub.s32 0, %v74_v27  ;;  %s218_s5 = scalar_lea.vmem %s147_s4, 256  ;;  %p223_p3 = scmp.lt.s32.totalorder %s147_s4, %s147_s4 }
  0x2b   :  { %v65_v11 = vmul.f32 1.442695, %v64_v10  ;;  %vm77_vm5 = vmand %vm75_vm3, %vm76_vm4  ;;  %p219_p2 = scmp.ne.s32.totalorder %s147_s4, %s218_s5  ;;  %p224_p4 = scmp.lt.s32.totalorder %s218_s5, %s218_s5 }
  0x2c   :  { %v84_v32 = vrot.slane %v159_v5, %v83_v30 }
  0x2d   :  { %v93_v3 = vld [vmem:[#allocation4] sm:$0x1]  ;;  %170 = vpow2.f32 %v65_v11  ;;  %v89_v25 = vld [vmem:[#allocation3] sm:$0x1]  ;;  %p225_p5 = por %p224_p4, %p223_p3 }
  0x2e   :  { %v96_v4 = vld [vmem:[#allocation5] sm:$0x1]  ;;  %v94_v8 = vadd.f32 %v159_v5, %v93_v3 }
  0x2f   :  { %v97_v9 = vadd.f32 %v160_v6, %v96_v4  ;;  %p226_p6 = pnand %p225_p5, %p219_p2 }
  0x30   :  { %95 = vst [vmem:[#allocation4] sm:$0x1] %v94_v8 }
  0x31   :  { %98 = vst [vmem:[#allocation5] sm:$0x1] %v97_v9 }
  0x37   :  { %v110_v12 = vld [vmem:[#allocation4] sm:$0x1]  ;;  %v171_v16 = vpop.eup %170 }
  0x38   :  { %v114_v13 = vld [vmem:[#allocation5] sm:$0x1]  ;;  %v111_v14 = vsel %vm106_vm2, %v110_v12, 0.0  ;;  %v67_v17 = vadd.f32 1.0, %v171_v16 }
  0x39   :  { %112 = vadd.xlane.f32.xlu0 %v111_v14  ;;  %v115_v15 = vsel %vm106_vm2, %v114_v13, 0.0 }
  0x3a   :  { %172 = vlog2.f32 %v67_v17 }
  0x3d   :  { %116 = vadd.xlane.f32.xlu0 %v115_v15 }
  0x44   :  { %v173_v21 = vpop.eup %172 }
  0x45   :  { %v69_v22 = vmul.f32 0.6931472, %v173_v21 }
  0x47   :  { %v70_v24 = vadd.f32 %v69_v22, %v62_v20 }
  0x49   :  { %v90_v26 = vmul.f32 %v160_v6, %v70_v24  ;;  %v80_v33 = vsel %vm77_vm5, %v72_v31, %v70_v24 }
  0x4a   :  { %v85_v36 = vmul.f32 %v84_v32, %v80_v33 }
  0x4b   :  { %v91_v28 = vadd.f32 %v90_v26, %v89_v25 }
  0x4d   :  { %92 = vst [vmem:[#allocation3] sm:$0x1] %v91_v28 }
  0x54   :  { %v105_v34 = vld [vmem:[#allocation3] sm:$0x1] }
  0x55   :  { %v107_v35 = vsel %vm106_vm2, %v105_v34, 0.0 }
  0x56   :  { %108 = vadd.xlane.f32.xlu1 %v107_v35 }
  0x5a   :  { %103 = vadd.xlane.f32.xlu1 %v85_v36 }
  0xc6   :  { %v113_v38 = vpop.xlane.xlu0 %112 }
  0xc7   :  { %v119_v41 = vrot.slane %v113_v38, 7 }
  0xca   :  { %v117_v39 = vpop.xlane.xlu0 %116 }
  0xcb   :  { %v122_v40 = vrot.slane %v117_v39, 6 }
  0xe3   :  { %v109_v42 = vpop.xlane.xlu1 %108 }
  0xe4   :  { %v124_v43 = vsel %vm106_vm2, %v109_v42, %v119_v41 }
  0xe5   :  { %v126_v44 = vsel %vm125_vm6, %v124_v43, %v122_v40 }
  0xe6   :  { %v128_v45 = vsel %vm127_vm7, %v126_v44, 0.0 }
  0xe7   :  { %136 = vperm.xlu1 %169, %v128_v45   ;;  %v104_v46 = vpop.xlane.xlu1 %103 }
  0xe8   :  { %131 = vperm.xlu0 %168, %v104_v46  }
 0x166   :  { %v137_v47 = vpop.permute.xlu1 %136 }
 0x167   :  { %140 = vst [vmem:[#allocation11 + $0x8] sm:$0xff] %v137_v47  ;;  %v132_v48 = vpop.permute.xlu0 %131 }
 0x168   :  { %139 = vst [vmem:[#allocation11] sm:$0xff] %v132_v48 }
 0x169   :  { %229 = shalt.err (!%p226_p6)
}
 0x16a   :  { %s230_s8 = scalar_lea.hbm %s310_s2, 256 }
 0x16b   :  { %p231_p7 = scmp.ne.s32.totalorder %s310_s2, %s230_s8  ;;  %p234_p8 = scmp.lt.u32.totalorder %s230_s8, %s310_s2 }
 0x16d   :  { %p236_p9 = pnand %p234_p8, %p231_p7 }
 0x16f   :  { %239 = shalt.err (!%p236_p9)
}
 0x170   :  { %s251_s13 = smov 128   ;;  %s252_s14 = smov 8  }
 0x171   :  { %152 = dma.vmem_to_hbm [thread:$0]  %s147_s4, 256, %s310_s2, [#allocation8], %s251_s13, %s251_s13, %s252_s14  }
 0x172   :  { %244 = dma.done.wait [#allocation8], 256  }
 0x173   :  { %245 = vsyncadd [#allocation8], 4294967040 }
 0x174   :  { %156 = vsyncpa [#allocation7], 1 }
 0x175   :  { %157 = vsyncpa [#allocation10], 1 }
 0x176   :  { %158 = vsyncpa [#allocation8], 1 }

</bundles_post_ra>
